<compile_context>
chip_gen: v5e
topology: v5e:2x2
jax: 0.10.0
libtpu: 0.0.40
codegen_flags: <defaults>
</compile_context>

<pallas_src>
import functools

import jax
import jax.numpy as jnp
from jax.experimental import pallas as pl
from jax.experimental.pallas import tpu as pltpu

IN_DIM = 4 + 2    # 6
IN_PAD = 8        # 6 features + ones row (bias fold) + zero row -> sublane aligned
HID = 64
OUT_DIM = 4 + 1   # 5
OUT_PAD = 8       # full-sublane output rows


def _mlp_kernel(x_ref, w1_ref, w2_ref, b2_ref, w3_ref, b3_ref, o_ref):
    """Fused 3-layer MLP on one batch tile, batch on the lane axis.

    x_ref : (IN_PAD, TB)   compute dtype; row 6 is all-ones (bias fold), row 7 zero
    w1_ref: (HID, IN_PAD)  compute dtype; column 6 holds b1, column 7 is zero
    w2_ref: (HID, HID)     compute dtype
    w3_ref: (OUT_PAD, HID) compute dtype; rows 5..7 are zero
    b2_ref: (HID, 1) f32, b3_ref: (OUT_PAD, 1) f32
    o_ref : (OUT_PAD, TB)  f32
    """
    x = x_ref[...]
    # Layer 1 -- bias folded into the matmul via the ones row of x.
    h = jnp.dot(w1_ref[...], x, preferred_element_type=jnp.float32)
    h = jnp.maximum(h, 0.0).astype(w2_ref.dtype)
    # Layer 2.
    h = jnp.dot(w2_ref[...], h, preferred_element_type=jnp.float32) + b2_ref[...]
    h = jnp.maximum(h, 0.0).astype(w3_ref.dtype)
    # Layer 3.
    y = jnp.dot(w3_ref[...], h, preferred_element_type=jnp.float32) + b3_ref[...]
    o_ref[...] = y.astype(o_ref.dtype)


def _round_up(n, m):
    return ((n + m - 1) // m) * m


def _const_spec(a):
    # Full-array block, constant index_map -> stays resident in VMEM across steps.
    return pl.BlockSpec(a.shape, lambda i: (0, 0))


@functools.partial(jax.jit, static_argnames=("tile_b", "compute_dtype"))
def cartpole_world_model_feature_major(xt, params, *, tile_b=8192,
                                       compute_dtype=jnp.bfloat16):
    """Feature-major forward: xt (6, B) f32 -> (5, B) f32.  No layout transposes."""
    w1, b1, w2, b2, w3, b3 = params
    B = xt.shape[1]

    # --- batch tiling --------------------------------------------------------
    b_min = _round_up(B, 128)
    tb = max(128, (int(tile_b) // 128) * 128)        # multiple of 128 (lane width)
    tb = min(tb, b_min)
    if b_min > 128:                                  # keep >= 2 grid steps (megacore)
        tb = min(tb, _round_up((b_min + 1) // 2, 128))
    b_pad = _round_up(B, tb)

    # --- operand prep (tiny; fused by XLA) -----------------------------------
    ones = jnp.ones((1, B), compute_dtype)
    x_aug = jnp.concatenate([xt.astype(compute_dtype), ones], axis=0)    # (7, B)
    x_aug = jnp.pad(x_aug, ((0, IN_PAD - IN_DIM - 1), (0, b_pad - B)))   # (8, b_pad)

    w1a = jnp.concatenate(
        [w1, b1[:, None], jnp.zeros((HID, IN_PAD - IN_DIM - 1), w1.dtype)],
        axis=1).astype(compute_dtype)                                    # (64, 8)
    w2c = w2.astype(compute_dtype)                                       # (64, 64)
    b2c = b2[:, None]                                                    # (64, 1) f32
    w3p = jnp.pad(w3, ((0, OUT_PAD - OUT_DIM), (0, 0))).astype(compute_dtype)  # (8,64)
    b3p = jnp.pad(b3, (0, OUT_PAD - OUT_DIM))[:, None]                   # (8, 1) f32

    # --- explicit VMEM budget: double-buffered x/out tiles + f32/bf16 h1/h2 ---
    isz = jnp.dtype(compute_dtype).itemsize
    vmem_est = (2 * IN_PAD * tb * isz + 2 * OUT_PAD * tb * 4
                + 2 * HID * tb * 4 + 2 * HID * tb * isz
                + OUT_PAD * tb * 4 + (1 << 20))
    vmem_limit = min(48 << 20, max(32 << 20, int(vmem_est * 5 // 4)))

    yt = pl.pallas_call(
        _mlp_kernel,
        out_shape=jax.ShapeDtypeStruct((OUT_PAD, b_pad), jnp.float32),
        grid=(b_pad // tb,),
        in_specs=[
            pl.BlockSpec((IN_PAD, tb), lambda i: (0, i)),   # streamed x tiles
            _const_spec(w1a), _const_spec(w2c), _const_spec(b2c),
            _const_spec(w3p), _const_spec(b3p),             # resident weights/biases
        ],
        out_specs=pl.BlockSpec((OUT_PAD, tb), lambda i: (0, i)),
        compiler_params=pltpu.CompilerParams(
            dimension_semantics=("parallel",),
            vmem_limit_bytes=vmem_limit,
        ),
    )(x_aug, w1a, w2c, b2c, w3p, b3p)

    return yt[:OUT_DIM, :B]


@functools.partial(jax.jit, static_argnames=("tile_b", "compute_dtype"))
def cartpole_world_model(x, params, *, tile_b=8192, compute_dtype=jnp.bfloat16):
    """Torch-semantics forward: x (B, 6) f32 -> (B, 5) f32."""
    yt = cartpole_world_model_feature_major(
        jnp.transpose(x), params, tile_b=tile_b, compute_dtype=compute_dtype)
    return jnp.transpose(yt)


def init_params(key):
    """PyTorch nn.Linear-style init; weights kept in torch layout (out, in)."""
    def linear(k, fan_in, fan_out):
        kw, kb = jax.random.split(k)
        bound = 1.0 / jnp.sqrt(jnp.float32(fan_in))
        w = jax.random.uniform(kw, (fan_out, fan_in), jnp.float32, -bound, bound)
        b = jax.random.uniform(kb, (fan_out,), jnp.float32, -bound, bound)
        return w, b

    k1, k2, k3 = jax.random.split(key, 3)
    w1, b1 = linear(k1, IN_DIM, HID)
    w2, b2 = linear(k2, HID, HID)
    w3, b3 = linear(k3, HID, OUT_DIM)
    return (w1, b1, w2, b2, w3, b3)


def reference_forward(x, params):
    """Plain-JAX reference in the torch (B, features) orientation, f32/HIGHEST."""
    w1, b1, w2, b2, w3, b3 = params
    hp = jax.lax.Precision.HIGHEST
    h = jnp.maximum(jnp.dot(x, w1.T, precision=hp) + b1, 0.0)
    h = jnp.maximum(jnp.dot(h, w2.T, precision=hp) + b2, 0.0)
    return jnp.dot(h, w3.T, precision=hp) + b3


if __name__ == "__main__":
    key = jax.random.PRNGKey(0)
    kx, kp = jax.random.split(key)

    # Small demo batch; deliberately not a multiple of 128 so the lane padding
    # and the 2-step parallel grid are exercised.
    B = 300
    x = jax.random.normal(kx, (B, IN_DIM), jnp.float32)
    params = init_params(kp)

    out = cartpole_world_model(x, params)   # bf16 matmul inputs, f32 accumulation
    out = jax.block_until_ready(out)

    ref = reference_forward(x, params)
    assert out.shape == (B, OUT_DIM), out.shape
    err = float(jnp.max(jnp.abs(out - ref)))
    # bf16 inputs/activations quantize to ~3 significant digits (intentional);
    # observed error is ~1e-2 scale, well within 5e-2 for this model.
    assert err < 5e-2, f"mismatch vs reference: {err}"

    print("KERNEL_OK")
</pallas_src>

<mosaic_0001>
module attributes {stable_mosaic.version = 11 : i64} {
  func.func @_mlp_kernel(%arg0: i32, %arg1: memref<8x256xbf16, #tpu.memory_space<vmem>>, %arg2: memref<64x8xbf16, #tpu.memory_space<vmem>>, %arg3: memref<64x64xbf16, #tpu.memory_space<vmem>>, %arg4: memref<64x1xf32, #tpu.memory_space<vmem>>, %arg5: memref<8x64xbf16, #tpu.memory_space<vmem>>, %arg6: memref<8x1xf32, #tpu.memory_space<vmem>>, %arg7: memref<8x256xf32, #tpu.memory_space<vmem>>) attributes {dimension_semantics = [#tpu.dimension_semantics<parallel>], iteration_bounds = array<i64: 2>, scalar_prefetch = 0 : i64, scratch_operands = 0 : i64, tpu.core_type = #tpu.core_type<tc>, window_params = [{transform_indices = @transform_0, window_bounds = array<i64: 8, 256>}, {pipeline_mode = #tpu.pipeline_mode<synchronous>, transform_indices = @transform_1, window_bounds = array<i64: 64, 8>}, {pipeline_mode = #tpu.pipeline_mode<synchronous>, transform_indices = @transform_2, window_bounds = array<i64: 64, 64>}, {pipeline_mode = #tpu.pipeline_mode<synchronous>, transform_indices = @transform_3, window_bounds = array<i64: 64, 1>}, {pipeline_mode = #tpu.pipeline_mode<synchronous>, transform_indices = @transform_4, window_bounds = array<i64: 8, 64>}, {pipeline_mode = #tpu.pipeline_mode<synchronous>, transform_indices = @transform_5, window_bounds = array<i64: 8, 1>}, {transform_indices = @transform_6, window_bounds = array<i64: 8, 256>}]} {
    %c0 = arith.constant 0 : index
    %c0_0 = arith.constant 0 : index
    %0 = vector.load %arg1[%c0, %c0_0] : memref<8x256xbf16, #tpu.memory_space<vmem>>, vector<8x256xbf16>
    %c0_1 = arith.constant 0 : index
    %c0_2 = arith.constant 0 : index
    %1 = vector.load %arg2[%c0_1, %c0_2] : memref<64x8xbf16, #tpu.memory_space<vmem>>, vector<64x8xbf16>
    %cst = arith.constant dense<0.000000e+00> : vector<64x256xf32>
    %2 = tpu.matmul %1, %0, %cst {dimension_numbers = #tpu.dot_dimension_numbers<[1], [0], [0], [1], [0, 0, 1, 1], [], []>} : vector<64x8xbf16>, vector<8x256xbf16>, vector<64x256xf32> -> vector<64x256xf32>
    %cst_3 = arith.constant 0.000000e+00 : f32
    %3 = vector.broadcast %cst_3 : f32 to vector<64x256xf32>
    %4 = arith.maximumf %2, %3 : vector<64x256xf32>
    %5 = arith.truncf %4 : vector<64x256xf32> to vector<64x256xbf16>
    %c0_4 = arith.constant 0 : index
    %c0_5 = arith.constant 0 : index
    %6 = vector.load %arg3[%c0_4, %c0_5] : memref<64x64xbf16, #tpu.memory_space<vmem>>, vector<64x64xbf16>
    %cst_6 = arith.constant dense<0.000000e+00> : vector<64x256xf32>
    %7 = tpu.matmul %6, %5, %cst_6 {dimension_numbers = #tpu.dot_dimension_numbers<[1], [0], [0], [1], [0, 0, 1, 1], [], []>} : vector<64x64xbf16>, vector<64x256xbf16>, vector<64x256xf32> -> vector<64x256xf32>
    %c0_7 = arith.constant 0 : index
    %c0_8 = arith.constant 0 : index
    %8 = vector.load %arg4[%c0_7, %c0_8] : memref<64x1xf32, #tpu.memory_space<vmem>>, vector<64x1xf32>
    %9 = vector.broadcast %8 : vector<64x1xf32> to vector<64x256xf32>
    %10 = arith.addf %7, %9 : vector<64x256xf32>
    %cst_9 = arith.constant 0.000000e+00 : f32
    %11 = vector.broadcast %cst_9 : f32 to vector<64x256xf32>
    %12 = arith.maximumf %10, %11 : vector<64x256xf32>
    %13 = arith.truncf %12 : vector<64x256xf32> to vector<64x256xbf16>
    %c0_10 = arith.constant 0 : index
    %c0_11 = arith.constant 0 : index
    %14 = vector.load %arg5[%c0_10, %c0_11] : memref<8x64xbf16, #tpu.memory_space<vmem>>, vector<8x64xbf16>
    %cst_12 = arith.constant dense<0.000000e+00> : vector<8x256xf32>
    %15 = tpu.matmul %14, %13, %cst_12 {dimension_numbers = #tpu.dot_dimension_numbers<[1], [0], [0], [1], [0, 0, 1, 1], [], []>} : vector<8x64xbf16>, vector<64x256xbf16>, vector<8x256xf32> -> vector<8x256xf32>
    %c0_13 = arith.constant 0 : index
    %c0_14 = arith.constant 0 : index
    %16 = vector.load %arg6[%c0_13, %c0_14] : memref<8x1xf32, #tpu.memory_space<vmem>>, vector<8x1xf32>
    %17 = vector.broadcast %16 : vector<8x1xf32> to vector<8x256xf32>
    %18 = arith.addf %15, %17 : vector<8x256xf32>
    %c0_15 = arith.constant 0 : index
    %c0_16 = arith.constant 0 : index
    %19 = vector.load %arg7[%c0_15, %c0_16] : memref<8x256xf32, #tpu.memory_space<vmem>>, vector<8x256xf32>
    tpu.vector_store %arg7[%c0_15, %c0_16], %18 {strides = array<i32>} : memref<8x256xf32, #tpu.memory_space<vmem>>, vector<8x256xf32>,
    return
  }
  func.func @transform_0(%arg0: i32) -> (i32, i32) {
    %c0_i32 = arith.constant 0 : i32
    %c0_i32_0 = arith.constant 0 : i32
    return %c0_i32, %arg0 : i32, i32
  }
  func.func @transform_1(%arg0: i32) -> (i32, i32) {
    %c0_i32 = arith.constant 0 : i32
    %c0_i32_0 = arith.constant 0 : i32
    %c0_i32_1 = arith.constant 0 : i32
    return %c0_i32, %c0_i32_0 : i32, i32
  }
  func.func @transform_2(%arg0: i32) -> (i32, i32) {
    %c0_i32 = arith.constant 0 : i32
    %c0_i32_0 = arith.constant 0 : i32
    %c0_i32_1 = arith.constant 0 : i32
    return %c0_i32, %c0_i32_0 : i32, i32
  }
  func.func @transform_3(%arg0: i32) -> (i32, i32) {
    %c0_i32 = arith.constant 0 : i32
    %c0_i32_0 = arith.constant 0 : i32
    %c0_i32_1 = arith.constant 0 : i32
    return %c0_i32, %c0_i32_0 : i32, i32
  }
  func.func @transform_4(%arg0: i32) -> (i32, i32) {
    %c0_i32 = arith.constant 0 : i32
    %c0_i32_0 = arith.constant 0 : i32
    %c0_i32_1 = arith.constant 0 : i32
    return %c0_i32, %c0_i32_0 : i32, i32
  }
  func.func @transform_5(%arg0: i32) -> (i32, i32) {
    %c0_i32 = arith.constant 0 : i32
    %c0_i32_0 = arith.constant 0 : i32
    %c0_i32_1 = arith.constant 0 : i32
    return %c0_i32, %c0_i32_0 : i32, i32
  }
  func.func @transform_6(%arg0: i32) -> (i32, i32) {
    %c0_i32 = arith.constant 0 : i32
    %c0_i32_0 = arith.constant 0 : i32
    return %c0_i32, %arg0 : i32, i32
  }
}

</mosaic_0001>

<bundles_post_ra>
// kernel: cartpole_world_model_feature_major.1
= control target key start
LH: loop header
LB: loop body
LE: loop exit
PB: predicated region body
PF: predicated region fallthrough
CT: control target
= control target key end

     0   :  { %s782_s21 = smov 0   ;;  %s867_s0 = inlined_call_operand.vmem [shape: bf16[8,512], index: 0, kind: input, shape index: {}]   ;;  %s868_s1 = inlined_call_operand.vmem [shape: bf16[64,8], index: 1, kind: input, shape index: {}]   ;;  %s869_s2 = inlined_call_operand.vmem [shape: bf16[64,64], index: 2, kind: input, shape index: {}]   ;;  %s870_s3 = inlined_call_operand.vmem [shape: f32[64,1], index: 3, kind: input, shape index: {}]   ;;  %s871_s4 = inlined_call_operand.vmem [shape: bf16[8,64], index: 4, kind: input, shape index: {}]   ;;  %s872_s5 = inlined_call_operand.vmem [shape: f32[8,1], index: 5, kind: input, shape index: {}]   ;;  %s873_s6 = inlined_call_operand.vmem [shape: f32[8,512], index: 6, kind: output, shape index: {}]  }
   0x1 LB: > { %s657_s22 = sadd.s32 4294967295, %s744_s21   ;;  %p661_p0 = scmp.ge.s32.totalorder %s744_s21, 1  ;;  %s744_s21 = sphi %s782_s21, %s16_s21  }
   0x2   : > { %p213_p1 = scmp.lt.s32.totalorder %s744_s21, 3 }
   0x4   : > { %p214_p2 = pnand %p661_p0, %p213_p1 }
   0x5   : > { %s662_s23 = sshll.u32 (!%p214_p2), %s657_s22, 1 }
   0x6   : > { %217 = sbr.rel (%p214_p2) target bundleno = 567 (0x237), region = 44  ;;  %p244_p3 = scmp.lt.s32.totalorder (!%p214_p2), %s662_s23, 3 }
   0xb   : > { %s875_s23 = smov (!%p244_p3, %s662_s23), 3  ;;  %vm303_vm0 = vcmask 1043456   ;;  %v718_v7 = vld [vmem:[%s868_s1] sm:$0xff]  ;;  %vm290_vm1 = vcmask 64512   ;;  %v719_v8 = vld [vmem:[%s868_s1 + $0x8] sm:$0xff]  ;;  %v720_v9 = vld [vmem:[%s868_s1 + $0x10] sm:$0xff] }
   0xc   : > { %s663_s24 = sshll.u32 %s875_s23, 2  ;;  %v721_v10 = vld [vmem:[%s868_s1 + $0x18] sm:$0xff]  ;;  %v746_v23 = vmov 0   ;;  %v406_v24 = vld [vmem:[%s870_s3 + $0x30] sm:$0xff]  ;;  %v404_v25 = vld [vmem:[%s870_s3 + $0x20] sm:$0xff]  ;;  %vm468_vm2 = vcmask 523264  }
   0xd   : > { %s247_s27 = scalar_lea.vmem %s867_s0, %s663_s24  ;;  %735 = vset.pattern.permute.xlu0 %v746_v23  ;;  %736 = vset.pattern.permute.xlu1 %v746_v23  ;;  %v407_v28 = vld [vmem:[%s870_s3 + $0x38] sm:$0xff]  ;;  %v405_v39 = vld [vmem:[%s870_s3 + $0x28] sm:$0xff]  ;;  %v400_v40 = vld [vmem:[%s870_s3] sm:$0xff]  ;;  %s665_s18 = sshll.u32 %s875_s23, 3 }
   0xe   : > { %v256_v0 = vld [vmem:[%s247_s27] sm:$0xff]  ;;  %737 = vset.pattern.permute.xlu2 %v746_v23  ;;  %440 = vperm.xlu0 %735, %v406_v24   ;;  %v401_v53 = vld [vmem:[%s870_s3 + $0x8] sm:$0xff]  ;;  %v402_v60 = vld [vmem:[%s870_s3 + $0x10] sm:$0xff]  ;;  %s253_s22 = scalar_lea.vmem %s873_s6, %s665_s18 }
   0xf   : > { %v286_v1 = vunpack.c.l.b16 %v256_v0  ;;  %v287_v2 = vunpack.c.h.b16 %v256_v0  ;;  %430 = vperm.xlu1 %736, %v404_v25   ;;  %v722_v58 = vld [vmem:[%s869_s2] sm:$0xff]  ;;  %v723_v59 = vld [vmem:[%s869_s2 + $0x8] sm:$0xff]  ;;  %420 = vperm.xlu2 %737, %v402_v60   ;;  %v403_v61 = vld [vmem:[%s870_s3 + $0x18] sm:$0xff] }
  0x10   : > { %v724_v62 = vld [vmem:[%s869_s2 + $0x10] sm:$0xff]  ;;  %v725_v63 = vld [vmem:[%s869_s2 + $0x18] sm:$0xff]  ;;  %v564_v0 = vld [vmem:[%s872_s5] sm:$0xff] }
  0x11   : > { %v288_v3 = vpack.c.b16 %v286_v1, %v286_v1  ;;  %v289_v4 = vpack.c.b16 %v287_v2, %v287_v2 }
  0x13   : > { %v305_v5 = vsel %vm303_vm0, %v288_v3, 0  ;;  %v308_v6 = vsel %vm303_vm0, %v289_v4, 0 }
  0x14   : > { %317 = vmatpush.bf16.msra.mxu0 %v305_v5  ;;  %346 = vmatpush.bf16.msra.mxu1 %v308_v6 }
  0x16   : > { %445 = vperm.xlu0 %735, %v407_v28  }
  0x17   : > { %682 = vmatmul.msk.bf16.vlgmr.msra.gmra.mxu0 %vm290_vm1, %v718_v7  ;;  %686 = vmatmul.msk.bf16.vlgmr.msra.gmra.mxu1 %vm290_vm1, %v718_v7 }
  0x18   : > { %435 = vperm.xlu1 %736, %v405_v39   ;;  %425 = vperm.xlu2 %737, %v403_v61  }
  0x1e   : > { %410 = vperm.xlu0 %735, %v400_v40  }
  0x20   : > { %415 = vperm.xlu1 %736, %v401_v53   ;;  %567 = vperm.xlu2 %737, %v564_v0  }
  0x27   : > { %683 = vmatmul.msk.bf16.gmra.mxu0 %vm290_vm1, %v719_v8  ;;  %687 = vmatmul.msk.bf16.gmra.mxu1 %vm290_vm1, %v719_v8 }
  0x37   : > { %684 = vmatmul.msk.bf16.gmra.mxu0 %vm290_vm1, %v720_v9  ;;  %688 = vmatmul.msk.bf16.gmra.mxu1 %vm290_vm1, %v720_v9 }
  0x47   : > { %685 = vmatmul.msk.bf16.gmra.mxu0 %vm290_vm1, %v721_v10  ;;  %689 = vmatmul.msk.bf16.gmra.mxu1 %vm290_vm1, %v721_v10 }
  0x94   : > { %v319_v11 = vpop.f32.mrf.mxu0  ;;  %v348_v12 = vpop.f32.mrf.mxu1 }
  0x95   : > { %v368_v54 = vmax.f32 %v319_v11, 0.0  ;;  %v369_v55 = vmax.f32 %v348_v12, 0.0 }
  0x9c   : > { %v321_v13 = vpop.f32.mrf.mxu0  ;;  %v350_v14 = vpop.f32.mrf.mxu1 }
  0x9d   : > { %v370_v49 = vmax.f32 %v321_v13, 0.0  ;;  %v371_v50 = vmax.f32 %v350_v14, 0.0  ;;  %v431_v13 = vpop.permute.xlu1 %430  ;;  %v441_v14 = vpop.permute.xlu0 %440 }
  0x9f   : > { %v384_v56 = vpack.c.bf16 %v370_v49, %v368_v54  ;;  %v385_v57 = vpack.c.bf16 %v371_v50, %v369_v55 }
  0xa4   : > { %v324_v15 = vpop.f32.mrf.mxu0  ;;  %v353_v16 = vpop.f32.mrf.mxu1 }
  0xa5   : > { %v372_v47 = vmax.f32 %v324_v15, 0.0  ;;  %v373_v48 = vmax.f32 %v353_v16, 0.0  ;;  %v421_v15 = vpop.permute.xlu2 %420 }
  0xac   : > { %v326_v17 = vpop.f32.mrf.mxu0  ;;  %v355_v18 = vpop.f32.mrf.mxu1 }
  0xad   : > { %v374_v43 = vmax.f32 %v326_v17, 0.0  ;;  %v375_v44 = vmax.f32 %v355_v18, 0.0  ;;  %v436_v18 = vpop.permute.xlu1 %435  ;;  %v426_v24 = vpop.permute.xlu2 %425 }
  0xaf   : > { %v386_v51 = vpack.c.bf16 %v374_v43, %v372_v47  ;;  %v387_v52 = vpack.c.bf16 %v375_v44, %v373_v48 }
  0xb4   : > { %v329_v19 = vpop.f32.mrf.mxu0  ;;  %v358_v20 = vpop.f32.mrf.mxu1 }
  0xb5   : > { %v376_v41 = vmax.f32 %v329_v19, 0.0  ;;  %v377_v42 = vmax.f32 %v358_v20, 0.0  ;;  %v446_v19 = vpop.permute.xlu0 %445 }
  0xbc   : > { %v331_v21 = vpop.f32.mrf.mxu0  ;;  %v360_v22 = vpop.f32.mrf.mxu1 }
  0xbd   : > { %v378_v35 = vmax.f32 %v331_v21, 0.0  ;;  %v379_v36 = vmax.f32 %v360_v22, 0.0 }
  0xbf   : > { %v388_v45 = vpack.c.bf16 %v378_v35, %v376_v41  ;;  %v389_v46 = vpack.c.bf16 %v379_v36, %v377_v42 }
  0xc4   : > { %v334_v26 = vpop.f32.mrf.mxu0  ;;  %v363_v27 = vpop.f32.mrf.mxu1 }
  0xc5   : > { %v380_v31 = vmax.f32 %v334_v26, 0.0  ;;  %v381_v32 = vmax.f32 %v363_v27, 0.0 }
  0xcc   : > { %v336_v29 = vpop.f32.mrf.mxu0  ;;  %v365_v30 = vpop.f32.mrf.mxu1 }
  0xcd   : > { %v382_v33 = vmax.f32 %v336_v29, 0.0  ;;  %v383_v34 = vmax.f32 %v365_v30, 0.0 }
  0xcf   : > { %v390_v37 = vpack.c.bf16 %v382_v33, %v380_v31  ;;  %v391_v38 = vpack.c.bf16 %v383_v34, %v381_v32 }
  0xd1   : > { %485 = vmatpush.bf16.msra.mxu2 %v390_v37  ;;  %514 = vmatpush.bf16.msra.mxu3 %v391_v38  ;;  %v416_v37 = vpop.permute.xlu1 %415 }
  0xd5   : > { %486 = vmatpush.bf16.msra.mxu2 %v388_v45  ;;  %515 = vmatpush.bf16.msra.mxu3 %v389_v46  ;;  %v411_v46 = vpop.permute.xlu0 %410 }
  0xd9   : > { %487 = vmatpush.bf16.msra.mxu2 %v386_v51  ;;  %516 = vmatpush.bf16.msra.mxu3 %v387_v52 }
  0xdd   : > { %488 = vmatpush.bf16.msra.mxu2 %v384_v56  ;;  %517 = vmatpush.bf16.msra.mxu3 %v385_v57 }
  0xe0   : > { %706 = vmatmul.msk.bf16.vlgmr.msra.gmra.mxu2 %vm468_vm2, %v722_v58  ;;  %710 = vmatmul.msk.bf16.vlgmr.msra.gmra.mxu3 %vm468_vm2, %v722_v58 }
  0xf0   : > { %707 = vmatmul.msk.bf16.gmra.mxu2 %vm468_vm2, %v723_v59  ;;  %711 = vmatmul.msk.bf16.gmra.mxu3 %vm468_vm2, %v723_v59 }
 0x100   : > { %708 = vmatmul.msk.bf16.gmra.mxu2 %vm468_vm2, %v724_v62  ;;  %712 = vmatmul.msk.bf16.gmra.mxu3 %vm468_vm2, %v724_v62 }
 0x110   : > { %709 = vmatmul.msk.bf16.gmra.mxu2 %vm468_vm2, %v725_v63  ;;  %713 = vmatmul.msk.bf16.gmra.mxu3 %vm468_vm2, %v725_v63 }
 0x163   : > { %v490_v1 = vpop.f32.mrf.mxu2  ;;  %v519_v2 = vpop.f32.mrf.mxu3 }
 0x164   : > { %v491_v53 = vadd.f32 %v490_v1, %v411_v46  ;;  %v520_v54 = vadd.f32 %v519_v2, %v411_v46  ;;  %v563_v1 = vld [vmem:[%s871_s4] sm:$0xf]  ;;  %v568_v2 = vpop.permute.xlu2 %567 }
 0x166   : > { %v539_v61 = vmax.f32 %v491_v53, 0.0  ;;  %v540_v62 = vmax.f32 %v520_v54, 0.0 }
 0x16b   : > { %v492_v3 = vpop.f32.mrf.mxu2  ;;  %v521_v4 = vpop.f32.mrf.mxu3 }
 0x16c   : > { %v493_v47 = vadd.f32 %v492_v3, %v416_v37  ;;  %v522_v48 = vadd.f32 %v521_v4, %v416_v37 }
 0x16e   : > { %v541_v57 = vmax.f32 %v493_v47, 0.0  ;;  %v542_v58 = vmax.f32 %v522_v48, 0.0 }
 0x170   : > { %v555_v63 = vpack.c.bf16 %v541_v57, %v539_v61  ;;  %v556_v0 = vpack.c.bf16 %v542_v58, %v540_v62 }
 0x173   : > { %v495_v5 = vpop.f32.mrf.mxu2  ;;  %v524_v6 = vpop.f32.mrf.mxu3 }
 0x174   : > { %v496_v42 = vadd.f32 %v495_v5, %v421_v15  ;;  %v525_v43 = vadd.f32 %v524_v6, %v421_v15 }
 0x176   : > { %v543_v55 = vmax.f32 %v496_v42, 0.0  ;;  %v544_v56 = vmax.f32 %v525_v43, 0.0 }
 0x17b   : > { %v497_v7 = vpop.f32.mrf.mxu2  ;;  %v526_v8 = vpop.f32.mrf.mxu3 }
 0x17c   : > { %v498_v35 = vadd.f32 %v497_v7, %v426_v24  ;;  %v527_v36 = vadd.f32 %v526_v8, %v426_v24 }
 0x17e   : > { %v545_v49 = vmax.f32 %v498_v35, 0.0  ;;  %v546_v50 = vmax.f32 %v527_v36, 0.0 }
 0x180   : > { %v557_v59 = vpack.c.bf16 %v545_v49, %v543_v55  ;;  %v558_v60 = vpack.c.bf16 %v546_v50, %v544_v56 }
 0x183   : > { %v500_v9 = vpop.f32.mrf.mxu2  ;;  %v529_v10 = vpop.f32.mrf.mxu3 }
 0x184   : > { %v501_v29 = vadd.f32 %v500_v9, %v431_v13  ;;  %v530_v30 = vadd.f32 %v529_v10, %v431_v13 }
 0x186   : > { %v547_v44 = vmax.f32 %v501_v29, 0.0  ;;  %v548_v45 = vmax.f32 %v530_v30, 0.0 }
 0x18b   : > { %v502_v11 = vpop.f32.mrf.mxu2  ;;  %v531_v12 = vpop.f32.mrf.mxu3 }
 0x18c   : > { %v503_v25 = vadd.f32 %v502_v11, %v436_v18  ;;  %v532_v26 = vadd.f32 %v531_v12, %v436_v18 }
 0x18e   : > { %v549_v38 = vmax.f32 %v503_v25, 0.0  ;;  %v550_v39 = vmax.f32 %v532_v26, 0.0 }
 0x190   : > { %v559_v51 = vpack.c.bf16 %v549_v38, %v547_v44  ;;  %v560_v52 = vpack.c.bf16 %v550_v39, %v548_v45 }
 0x193   : > { %v505_v16 = vpop.f32.mrf.mxu2  ;;  %v534_v17 = vpop.f32.mrf.mxu3 }
 0x194   : > { %v506_v20 = vadd.f32 %v505_v16, %v441_v14  ;;  %v535_v21 = vadd.f32 %v534_v17, %v441_v14 }
 0x196   : > { %v551_v31 = vmax.f32 %v506_v20, 0.0  ;;  %v552_v32 = vmax.f32 %v535_v21, 0.0 }
 0x19b   : > { %v507_v22 = vpop.f32.mrf.mxu2  ;;  %v536_v23 = vpop.f32.mrf.mxu3 }
 0x19c   : > { %v508_v27 = vadd.f32 %v507_v22, %v446_v19  ;;  %v537_v28 = vadd.f32 %v536_v23, %v446_v19 }
 0x19e   : > { %v553_v33 = vmax.f32 %v508_v27, 0.0  ;;  %v554_v34 = vmax.f32 %v537_v28, 0.0 }
 0x1a0   : > { %v561_v40 = vpack.c.bf16 %v553_v33, %v551_v31  ;;  %v562_v41 = vpack.c.bf16 %v554_v34, %v552_v32 }
 0x1a2   : > { %577 = vmatpush.bf16.msrb.mxu0 %v561_v40  ;;  %590 = vmatpush.bf16.msrb.mxu1 %v562_v41 }
 0x1a6   : > { %578 = vmatpush.bf16.msrb.mxu0 %v559_v51  ;;  %591 = vmatpush.bf16.msrb.mxu1 %v560_v52 }
 0x1aa   : > { %579 = vmatpush.bf16.msrb.mxu0 %v557_v59  ;;  %592 = vmatpush.bf16.msrb.mxu1 %v558_v60 }
 0x1ae   : > { %580 = vmatpush.bf16.msrb.mxu0 %v555_v63  ;;  %593 = vmatpush.bf16.msrb.mxu1 %v556_v0 }
 0x1b1   : > { %714 = vmatmul.msk.bf16.vlgmr.msrb.gmra.mxu0 %vm468_vm2, %v563_v1  ;;  %715 = vmatmul.msk.bf16.vlgmr.msrb.gmra.mxu1 %vm468_vm2, %v563_v1 }
 0x22e   : > { %v582_v3 = vpop.f32.mrf.mxu0  ;;  %v595_v4 = vpop.f32.mrf.mxu1 }
 0x22f   : > { %v583_v5 = vadd.f32 %v582_v3, %v568_v2  ;;  %v596_v6 = vadd.f32 %v595_v4, %v568_v2 }
 0x231   : > { %599 = vst [vmem:[%s253_s22] sm:$0xff] %v583_v5 }
 0x232   : > { %600 = vst [vmem:[%s253_s22 + $0x8] sm:$0xff] %v596_v6 }
 0x236   : > { %v584_v7 = vpop.f32.mrf.mxu0  ;;  %v597_v8 = vpop.f32.mrf.mxu1 }
 0x237 PF: > { %s16_s21 = sadd.s32 1, %s744_s21  }
 0x238   : > { %p13_p4 = scmp.ge.s32.totalorder %s16_s21, 4  }
 0x23a   :  { %15 = sbr.rel (!%p13_p4) target bundleno = 1 (0x1), region = 74 }

</bundles_post_ra>
